<compile_context>
chip_gen: v7x
topology: tpu7x:2x2x1
jax: 0.10.0
libtpu: 0.0.40
codegen_flags: <defaults>
</compile_context>

<pallas_src>
import jax
import jax.numpy as jnp
from jax.experimental import pallas as pl
from jax.experimental.pallas import tpu as pltpu


def _round_up(x, m):
    return ((x + m - 1) // m) * m


def _im2col_nhwc(x, ksize, stride, padding):
    """x: (N, H, W, C) -> patches (N*Ho*Wo, ksize*ksize*C), feature order (kh, kw, c)."""
    n, h, w, c = x.shape
    xp = jnp.pad(x, ((0, 0), (padding, padding), (padding, padding), (0, 0)))
    hp, wp = h + 2 * padding, w + 2 * padding
    ho = (hp - ksize) // stride + 1
    wo = (wp - ksize) // stride + 1
    cols = []
    for kh in range(ksize):
        for kw in range(ksize):
            cols.append(xp[:, kh:kh + stride * (ho - 1) + 1:stride,
                           kw:kw + stride * (wo - 1) + 1:stride, :])
    patches = jnp.concatenate(cols, axis=-1)                     # (N, Ho, Wo, K*K*C)
    return patches.reshape(n * ho * wo, ksize * ksize * c), ho, wo


def _make_fused_kernel(act, negative_slope, apply_norm, keep_prob):
    use_dropout = keep_prob is not None

    def kernel(p_ref, w_ref, b_ref, mean_ref, std_ref, *rest):
        if use_dropout:
            u_ref, o_ref = rest
        else:
            (o_ref,) = rest
        # MXU: (TM, Kdim) @ (Kdim, Cout), accumulate in f32.
        y = jnp.dot(p_ref[...], w_ref[...], preferred_element_type=jnp.float32)
        y = y + b_ref[...].astype(jnp.float32)
        if act == "relu":
            y = jnp.maximum(y, 0.0)
        elif act == "leaky":
            y = jnp.where(y >= 0.0, y, jnp.float32(negative_slope) * y)
        # act == "linear": identity
        if apply_norm:  # CustomBatchNorm2d: (x - mean) / (std + 1e-5)
            y = (y - mean_ref[...].astype(jnp.float32)) / (
                std_ref[...].astype(jnp.float32) + 1e-5)
        if use_dropout:  # train-mode nn.Dropout: inverted dropout via select
            y = jnp.where(u_ref[...] < jnp.float32(keep_prob),
                          y * jnp.float32(1.0 / keep_prob), 0.0)
        o_ref[...] = y.astype(o_ref.dtype)

    return kernel


def fused_conv_block(x_nhwc, w_hwio, bias, mean_vec, std_vec, *, stride, padding,
                     act, negative_slope, apply_norm, keep_prob=None,
                     dropout_key=None, max_block_rows=4096):
    """One BaseG sub-block: conv (+bias) -> activation -> custom norm [-> dropout]."""
    n, _, _, _ = x_nhwc.shape
    ksize = w_hwio.shape[0]
    cout = w_hwio.shape[-1]

    patches, ho, wo = _im2col_nhwc(x_nhwc, ksize, stride, padding)
    m, kdim = patches.shape
    w2d = w_hwio.reshape(kdim, cout)
    b2d = bias.reshape(1, cout).astype(jnp.float32)
    mean2d = jnp.asarray(mean_vec, jnp.float32).reshape(1, cout)
    std2d = jnp.asarray(std_vec, jnp.float32).reshape(1, cout)

    # Row-tile size: MiB-scale blocks (mem-bound sweet spot) but capped so the
    # double-buffered input + output blocks comfortably fit v7x's smaller VMEM.
    bytes_per_row = 4 * (kdim + 2 * cout)
    vmem_rows = max(8, ((4 * 1024 * 1024) // bytes_per_row) // 8 * 8)
    tm = min(_round_up(m, 8), vmem_rows, max_block_rows)
    grid = (pl.cdiv(m, tm),)

    in_specs = [
        pl.BlockSpec((tm, kdim), lambda i: (i, 0)),     # patch rows (tiled)
        pl.BlockSpec((kdim, cout), lambda i: (0, 0)),   # weights (resident)
        pl.BlockSpec((1, cout), lambda i: (0, 0)),      # bias
        pl.BlockSpec((1, cout), lambda i: (0, 0)),      # mean
        pl.BlockSpec((1, cout), lambda i: (0, 0)),      # std
    ]
    inputs = [patches, w2d, b2d, mean2d, std2d]
    if keep_prob is not None:
        if dropout_key is None:
            dropout_key = jax.random.PRNGKey(0)
        # TODO(synk): on real TPU this could use in-kernel pltpu.prng_random_bits with an
        # integer threshold; generated host-side here so the kernel also runs interpreted.
        u = jax.random.uniform(dropout_key, (m, cout), dtype=jnp.float32)
        in_specs.append(pl.BlockSpec((tm, cout), lambda i: (i, 0)))
        inputs.append(u)

    out = pl.pallas_call(
        _make_fused_kernel(act, negative_slope, apply_norm, keep_prob),
        out_shape=jax.ShapeDtypeStruct((m, cout), x_nhwc.dtype),
        grid_spec=pl.GridSpec(
            grid=grid,
            in_specs=in_specs,
            out_specs=pl.BlockSpec((tm, cout), lambda i: (i, 0)),
        ),
        compiler_params=pltpu.CompilerParams(
            dimension_semantics=("parallel",),   # independent row tiles -> both v7x TCs
        ),
    )(*inputs)
    return out.reshape(n, ho, wo, cout)


class BaseGPallas:
    """JAX/Pallas equivalent of the PyTorch BaseG module (forward pass)."""

    def __init__(self, in_channels, out_channels, kernel_size, padding, stride,
                 dropout=False, norm='custom', activation='relu', mean=0.0, std=1.0,
                 key=None, dtype=jnp.float32):
        if activation not in ('relu', 'leaky', 'linear'):
            raise ValueError("activation must be 'relu', 'leaky' or 'linear'")
        if norm in ('batch', 'instance'):
            # TODO(synk): nn.BatchNorm2d / nn.InstanceNorm2d (running stats / affine) not implemented.
            raise NotImplementedError("only norm='custom' (default) or identity is supported")
        # Faithful to the reference: nn.Conv2d(in, out, k, padding, stride) binds
        # positionally as Conv2d(..., stride=<padding arg>, padding=<stride arg>).
        self.conv_stride = int(padding)
        self.conv_padding = int(stride)
        self.kernel_size = int(kernel_size)
        self.act = activation
        self.neg_slope = 0.2
        self.apply_norm = (norm == 'custom')
        self.keep_prob = 0.7 if dropout else None      # nn.Dropout(0.3), train mode
        self.dtype = dtype

        if key is None:
            key = jax.random.PRNGKey(0)
        kw1, kb1, kw2, kb2 = jax.random.split(key, 4)
        ksz = self.kernel_size

        def init_conv(kw, kb, cin, cout):
            fan_in = cin * ksz * ksz
            bound = 1.0 / (fan_in ** 0.5)
            w = jax.random.uniform(kw, (ksz, ksz, cin, cout), dtype, -bound, bound)  # HWIO
            b = jax.random.uniform(kb, (cout,), dtype, -bound, bound)
            return w, b

        self.w1, self.b1 = init_conv(kw1, kb1, in_channels, out_channels)
        self.w2, self.b2 = init_conv(kw2, kb2, out_channels, out_channels)

        # scalar or per-channel mean/std, broadcast like torch.tensor(...).view(1,-1,1,1)
        mean_arr = jnp.broadcast_to(jnp.asarray(mean, jnp.float32).reshape(1, -1),
                                    (1, out_channels))
        std_arr = jnp.broadcast_to(jnp.asarray(std, jnp.float32).reshape(1, -1),
                                   (1, out_channels))
        self.mean_vec = mean_arr.reshape(out_channels)
        self.std_vec = std_arr.reshape(out_channels)

    def __call__(self, x_nchw, dropout_key=None):
        x = jnp.transpose(x_nchw, (0, 2, 3, 1)).astype(self.dtype)   # NCHW -> NHWC
        if self.keep_prob is not None:
            if dropout_key is None:
                dropout_key = jax.random.PRNGKey(0)
            dk1, dk2 = jax.random.split(dropout_key)
        else:
            dk1 = dk2 = None
        common = dict(stride=self.conv_stride, padding=self.conv_padding,
                      act=self.act, negative_slope=self.neg_slope,
                      apply_norm=self.apply_norm, keep_prob=self.keep_prob)
        x = fused_conv_block(x, self.w1, self.b1, self.mean_vec, self.std_vec,
                             dropout_key=dk1, **common)
        x = fused_conv_block(x, self.w2, self.b2, self.mean_vec, self.std_vec,
                             dropout_key=dk2, **common)
        return jnp.transpose(x, (0, 3, 1, 2))                        # NHWC -> NCHW

    def reference(self, x_nchw):
        """Pure-JAX (XLA) reference of the same forward, dropout disabled."""
        assert self.keep_prob is None
        x = jnp.transpose(x_nchw, (0, 2, 3, 1)).astype(self.dtype)

        def block(x, w, b):
            y = jax.lax.conv_general_dilated(
                x, w, window_strides=(self.conv_stride, self.conv_stride),
                padding=[(self.conv_padding, self.conv_padding)] * 2,
                dimension_numbers=('NHWC', 'HWIO', 'NHWC'))
            y = y + b.reshape(1, 1, 1, -1)
            if self.act == 'relu':
                y = jnp.maximum(y, 0.0)
            elif self.act == 'leaky':
                y = jnp.where(y >= 0.0, y, self.neg_slope * y)
            if self.apply_norm:
                y = (y - self.mean_vec.reshape(1, 1, 1, -1)) / (
                    self.std_vec.reshape(1, 1, 1, -1) + 1e-5)
            return y

        x = block(x, self.w1, self.b1)
        x = block(x, self.w2, self.b2)
        return jnp.transpose(x, (0, 3, 1, 2))


if __name__ == "__main__":
    key = jax.random.PRNGKey(0)
    k_params, k_params2, k_x = jax.random.split(key, 3)

    B, Cin, H, W = 2, 4, 16, 16
    Cout, Ksz, padding, stride = 8, 3, 1, 1
    x = jax.random.normal(k_x, (B, Cin, H, W), dtype=jnp.float32)

    # Default BaseG config: relu + custom norm, no dropout.
    model = BaseGPallas(Cin, Cout, Ksz, padding, stride, dropout=False, norm='custom',
                        activation='relu', mean=0.1, std=1.5, key=k_params)
    y = jax.block_until_ready(model(x))
    assert y.shape == (B, Cout, H, W) and y.dtype == jnp.float32
    y_ref = model.reference(x)
    max_err = float(jnp.max(jnp.abs(y - y_ref)))
    assert jnp.allclose(y, y_ref, atol=2e-4, rtol=2e-4), max_err

    # Exercise the leaky-activation + dropout path (shape / finiteness check only).
    model_d = BaseGPallas(Cin, Cout, Ksz, padding, stride, dropout=True, norm='custom',
                          activation='leaky', mean=0.0, std=1.0, key=k_params2)
    yd = jax.block_until_ready(model_d(x, dropout_key=jax.random.PRNGKey(7)))
    assert yd.shape == (B, Cout, H, W)
    assert bool(jnp.all(jnp.isfinite(yd)))

    print("KERNEL_OK")
</pallas_src>

<mosaic_0001>
module attributes {stable_mosaic.version = 11 : i64} {
  func.func @kernel(%arg0: i32, %arg1: memref<512x36xf32, #tpu.memory_space<vmem>>, %arg2: memref<36x8xf32, #tpu.memory_space<vmem>>, %arg3: memref<1x8xf32, #tpu.memory_space<vmem>>, %arg4: memref<1x8xf32, #tpu.memory_space<vmem>>, %arg5: memref<1x8xf32, #tpu.memory_space<vmem>>, %arg6: memref<512x8xf32, #tpu.memory_space<vmem>>) attributes {dimension_semantics = [#tpu.dimension_semantics<parallel>], iteration_bounds = array<i64: 1>, scalar_prefetch = 0 : i64, scratch_operands = 0 : i64, tpu.core_type = #tpu.core_type<tc>, window_params = [{transform_indices = @transform_0, window_bounds = array<i64: 512, 36>}, {pipeline_mode = #tpu.pipeline_mode<synchronous>, transform_indices = @transform_1, window_bounds = array<i64: 36, 8>}, {pipeline_mode = #tpu.pipeline_mode<synchronous>, transform_indices = @transform_2, window_bounds = array<i64: 1, 8>}, {pipeline_mode = #tpu.pipeline_mode<synchronous>, transform_indices = @transform_3, window_bounds = array<i64: 1, 8>}, {pipeline_mode = #tpu.pipeline_mode<synchronous>, transform_indices = @transform_4, window_bounds = array<i64: 1, 8>}, {transform_indices = @transform_5, window_bounds = array<i64: 512, 8>}]} {
    %c0 = arith.constant 0 : index
    %c0_0 = arith.constant 0 : index
    %0 = vector.load %arg1[%c0, %c0_0] : memref<512x36xf32, #tpu.memory_space<vmem>>, vector<512x36xf32>
    %c0_1 = arith.constant 0 : index
    %c0_2 = arith.constant 0 : index
    %1 = vector.load %arg2[%c0_1, %c0_2] : memref<36x8xf32, #tpu.memory_space<vmem>>, vector<36x8xf32>
    %cst = arith.constant dense<0.000000e+00> : vector<512x8xf32>
    %2 = tpu.matmul %0, %1, %cst {dimension_numbers = #tpu.dot_dimension_numbers<[1], [0], [0], [1], [0, 0, 1, 1], [], []>} : vector<512x36xf32>, vector<36x8xf32>, vector<512x8xf32> -> vector<512x8xf32>
    %c0_3 = arith.constant 0 : index
    %c0_4 = arith.constant 0 : index
    %3 = vector.load %arg3[%c0_3, %c0_4] : memref<1x8xf32, #tpu.memory_space<vmem>>, vector<1x8xf32>
    %4 = vector.broadcast %3 : vector<1x8xf32> to vector<512x8xf32>
    %5 = arith.addf %2, %4 : vector<512x8xf32>
    %cst_5 = arith.constant 0.000000e+00 : f32
    %6 = vector.broadcast %cst_5 : f32 to vector<512x8xf32>
    %7 = arith.maximumf %5, %6 : vector<512x8xf32>
    %c0_6 = arith.constant 0 : index
    %c0_7 = arith.constant 0 : index
    %8 = vector.load %arg4[%c0_6, %c0_7] : memref<1x8xf32, #tpu.memory_space<vmem>>, vector<1x8xf32>
    %9 = vector.broadcast %8 : vector<1x8xf32> to vector<512x8xf32>
    %10 = arith.subf %7, %9 : vector<512x8xf32>
    %c0_8 = arith.constant 0 : index
    %c0_9 = arith.constant 0 : index
    %11 = vector.load %arg5[%c0_8, %c0_9] : memref<1x8xf32, #tpu.memory_space<vmem>>, vector<1x8xf32>
    %cst_10 = arith.constant 9.99999974E-6 : f32
    %12 = vector.broadcast %cst_10 : f32 to vector<1x8xf32>
    %13 = arith.addf %11, %12 : vector<1x8xf32>
    %14 = vector.broadcast %13 : vector<1x8xf32> to vector<512x8xf32>
    %15 = arith.divf %10, %14 : vector<512x8xf32>
    %c0_11 = arith.constant 0 : index
    %c0_12 = arith.constant 0 : index
    %16 = vector.load %arg6[%c0_11, %c0_12] : memref<512x8xf32, #tpu.memory_space<vmem>>, vector<512x8xf32>
    tpu.vector_store %arg6[%c0_11, %c0_12], %15 {strides = array<i32>} : memref<512x8xf32, #tpu.memory_space<vmem>>, vector<512x8xf32>,
    return
  }
  func.func @transform_0(%arg0: i32) -> (i32, i32) {
    %c0_i32 = arith.constant 0 : i32
    %c0_i32_0 = arith.constant 0 : i32
    return %arg0, %c0_i32 : i32, i32
  }
  func.func @transform_1(%arg0: i32) -> (i32, i32) {
    %c0_i32 = arith.constant 0 : i32
    %c0_i32_0 = arith.constant 0 : i32
    %c0_i32_1 = arith.constant 0 : i32
    return %c0_i32, %c0_i32_0 : i32, i32
  }
  func.func @transform_2(%arg0: i32) -> (i32, i32) {
    %c0_i32 = arith.constant 0 : i32
    %c0_i32_0 = arith.constant 0 : i32
    %c0_i32_1 = arith.constant 0 : i32
    return %c0_i32, %c0_i32_0 : i32, i32
  }
  func.func @transform_3(%arg0: i32) -> (i32, i32) {
    %c0_i32 = arith.constant 0 : i32
    %c0_i32_0 = arith.constant 0 : i32
    %c0_i32_1 = arith.constant 0 : i32
    return %c0_i32, %c0_i32_0 : i32, i32
  }
  func.func @transform_4(%arg0: i32) -> (i32, i32) {
    %c0_i32 = arith.constant 0 : i32
    %c0_i32_0 = arith.constant 0 : i32
    %c0_i32_1 = arith.constant 0 : i32
    return %c0_i32, %c0_i32_0 : i32, i32
  }
  func.func @transform_5(%arg0: i32) -> (i32, i32) {
    %c0_i32 = arith.constant 0 : i32
    %c0_i32_0 = arith.constant 0 : i32
    return %arg0, %c0_i32 : i32, i32
  }
}

</mosaic_0001>

<bundles_post_ra>
// kernel: tpu_custom_call.1
= control target key start
LH: loop header
LB: loop body
LE: loop exit
PB: predicated region body
PF: predicated region fallthrough
CT: control target
= control target key end

     0   :  { %vm96_vm0 = vcmask 293888   ;;  %vm289_vm1 = vcmask 1043456   ;;  %vm886_vm2 = vcmask 64512   ;;  %s1977_s1 = inlined_call_operand.vmem [shape: f32[36,8], index: 1, kind: input, shape index: {}]   ;;  %s1978_s0 = inlined_call_operand.vmem [shape: f32[512,36], index: 0, kind: input, shape index: {}]   ;;  %s1979_s4 = inlined_call_operand.vmem [shape: f32[1,8], index: 4, kind: input, shape index: {}]   ;;  %s1980_s2 = inlined_call_operand.vmem [shape: f32[1,8], index: 2, kind: input, shape index: {}]   ;;  %s1981_s3 = inlined_call_operand.vmem [shape: f32[1,8], index: 3, kind: input, shape index: {}]   ;;  %s1982_s5 = inlined_call_operand.vmem [shape: f32[512,8], index: 5, kind: output, shape index: {}]  }
   0x1   :  { %v84_v0 = vld [vmem:[%s1977_s1] sm:$0xff]  ;;  %v85_v1 = vld [vmem:[%s1977_s1 + $0x8] sm:$0xff]  ;;  %v86_v2 = vld [vmem:[%s1977_s1 + $0x10] sm:$0xff] }
   0x2   :  { %v1197_v3 = vpack.c.bf16 %v85_v1, %v84_v0  ;;  %v87_v4 = vld [vmem:[%s1977_s1 + $0x18] sm:$0xff]  ;;  %v20_v5 = vld [vmem:[%s1978_s0] sm:$0xff]  ;;  %v21_v9 = vld [vmem:[%s1978_s0 + $0x8] sm:$0xff] }
   0x3   :  { %v1201_v6 = vpack.c.bf16 %v87_v4, %v86_v2  ;;  %1101 = vmatprep.mubr.msk.f32.mxu0 %vm96_vm0, %v20_v5  ;;  %v52_v7 = vld [vmem:[%s1978_s0 + $0x100] sm:$0xff]  ;;  %v53_v10 = vld [vmem:[%s1978_s0 + $0x108] sm:$0xff]  ;;  %v22_v11 = vld [vmem:[%s1978_s0 + $0x10] sm:$0xff] }
   0x4   :  { %1198 = vmatprep.subr.bf16.mxu0 %v1197_v3  ;;  %1205 = vmatprep.subr.bf16.mxu1 %v1197_v3  ;;  %v88_v8 = vld [vmem:[%s1977_s1 + $0x20] sm:$0xf]  ;;  %v54_v12 = vld [vmem:[%s1978_s0 + $0x110] sm:$0xff]  ;;  %v23_v13 = vld [vmem:[%s1978_s0 + $0x18] sm:$0xff] }
   0x5   :  { %1200 = vmatpush3.bf16.msra.mxu0 %v1197_v3  ;;  %1208 = vmatpush3.bf16.msra.mxu1 %v1197_v3  ;;  %v55_v14 = vld [vmem:[%s1978_s0 + $0x118] sm:$0xff]  ;;  %v24_v15 = vld [vmem:[%s1978_s0 + $0x20] sm:$0xff]  ;;  %v25_v17 = vld [vmem:[%s1978_s0 + $0x28] sm:$0xff] }
   0x6   :  { %1202 = vmatprep.subr.bf16.mxu0 %v1201_v6  ;;  %1206 = vmatprep.subr.bf16.mxu1 %v1201_v6  ;;  %v56_v16 = vld [vmem:[%s1978_s0 + $0x120] sm:$0xff]  ;;  %v57_v18 = vld [vmem:[%s1978_s0 + $0x128] sm:$0xff]  ;;  %v26_v19 = vld [vmem:[%s1978_s0 + $0x30] sm:$0xff] }
   0x7   :  { %1149 = vmatprep.mubr.msk.f32.mxu1 %vm96_vm0, %v52_v7  ;;  %v58_v20 = vld [vmem:[%s1978_s0 + $0x130] sm:$0xff]  ;;  %v27_v21 = vld [vmem:[%s1978_s0 + $0x38] sm:$0xff]  ;;  %v28_v23 = vld [vmem:[%s1978_s0 + $0x40] sm:$0xff]  ;;  %v816_v7 = vlaneseq }
   0x8   :  { %v59_v22 = vld [vmem:[%s1978_s0 + $0x138] sm:$0xff]  ;;  %v60_v24 = vld [vmem:[%s1978_s0 + $0x140] sm:$0xff]  ;;  %v29_v25 = vld [vmem:[%s1978_s0 + $0x48] sm:$0xff] }
   0x9   :  { %1204 = vmatpush3.bf16.msra.mxu0 %v1201_v6  ;;  %1209 = vmatpush3.bf16.msra.mxu1 %v1201_v6  ;;  %v61_v26 = vld [vmem:[%s1978_s0 + $0x148] sm:$0xff]  ;;  %v30_v27 = vld [vmem:[%s1978_s0 + $0x50] sm:$0xff]  ;;  %v31_v29 = vld [vmem:[%s1978_s0 + $0x58] sm:$0xff] }
   0xa   :  { %1099 = vmatprep.subr.msk.mxu0 %vm289_vm1, %v88_v8  ;;  %1207 = vmatprep.subr.msk.mxu1 %vm289_vm1, %v88_v8  ;;  %v62_v28 = vld [vmem:[%s1978_s0 + $0x150] sm:$0xff]  ;;  %v63_v30 = vld [vmem:[%s1978_s0 + $0x158] sm:$0xff]  ;;  %v32_v31 = vld [vmem:[%s1978_s0 + $0x60] sm:$0xff] }
   0xb   :  { %v64_v32 = vld [vmem:[%s1978_s0 + $0x160] sm:$0xff]  ;;  %v33_v33 = vld [vmem:[%s1978_s0 + $0x68] sm:$0xff]  ;;  %v34_v35 = vld [vmem:[%s1978_s0 + $0x70] sm:$0xff] }
   0xc   :  { %v65_v34 = vld [vmem:[%s1978_s0 + $0x168] sm:$0xff]  ;;  %v66_v36 = vld [vmem:[%s1978_s0 + $0x170] sm:$0xff]  ;;  %v35_v37 = vld [vmem:[%s1978_s0 + $0x78] sm:$0xff] }
   0xd   :  { %1100 = vmatpush3.msk.msra.mxu0 %vm289_vm1, %v88_v8  ;;  %1210 = vmatpush3.msk.msra.mxu1 %vm289_vm1, %v88_v8  ;;  %v67_v38 = vld [vmem:[%s1978_s0 + $0x178] sm:$0xff]  ;;  %v36_v39 = vld [vmem:[%s1978_s0 + $0x80] sm:$0xff]  ;;  %v37_v41 = vld [vmem:[%s1978_s0 + $0x88] sm:$0xff]  ;;  %v817_v8 = vshrl.u32 %v816_v7, 7 }
   0xe   :  { %1102 = vmatmul.mubr.msk.f32.vlgmr.msra.gmra.mrb[0].mxu0 %vm96_vm0, %v21_v9  ;;  %1150 = vmatmul.mubr.msk.f32.vlgmr.msra.gmra.mrb[0].mxu1 %vm96_vm0, %v53_v10  ;;  %v68_v40 = vld [vmem:[%s1978_s0 + $0x180] sm:$0xff]  ;;  %v69_v42 = vld [vmem:[%s1978_s0 + $0x188] sm:$0xff]  ;;  %v38_v43 = vld [vmem:[%s1978_s0 + $0x90] sm:$0xff] }
   0xf   :  { %1104 = vmatprep.mubr.msk.f32.mxu0 %vm96_vm0, %v22_v11  ;;  %1152 = vmatprep.mubr.msk.f32.mxu1 %vm96_vm0, %v54_v12  ;;  %v70_v44 = vld [vmem:[%s1978_s0 + $0x190] sm:$0xff]  ;;  %v39_v45 = vld [vmem:[%s1978_s0 + $0x98] sm:$0xff]  ;;  %v40_v47 = vld [vmem:[%s1978_s0 + $0xa0] sm:$0xff]  ;;  %v818_v11 = vsub.s32 0, %v817_v8 }
  0x10   :  { %v71_v46 = vld [vmem:[%s1978_s0 + $0x198] sm:$0xff]  ;;  %v72_v48 = vld [vmem:[%s1978_s0 + $0x1a0] sm:$0xff]  ;;  %v41_v49 = vld [vmem:[%s1978_s0 + $0xa8] sm:$0xff] }
  0x11   :  { %v73_v50 = vld [vmem:[%s1978_s0 + $0x1a8] sm:$0xff]  ;;  %v42_v51 = vld [vmem:[%s1978_s0 + $0xb0] sm:$0xff]  ;;  %v43_v53 = vld [vmem:[%s1978_s0 + $0xb8] sm:$0xff] }
  0x12   :  { %1105 = vmatmul.mubr.msk.f32.gmra.mrb[2].mxu0 %vm96_vm0, %v23_v13  ;;  %1153 = vmatmul.mubr.msk.f32.gmra.mrb[2].mxu1 %vm96_vm0, %v55_v14  ;;  %v74_v52 = vld [vmem:[%s1978_s0 + $0x1b0] sm:$0xff]  ;;  %v75_v54 = vld [vmem:[%s1978_s0 + $0x1b8] sm:$0xff]  ;;  %v44_v55 = vld [vmem:[%s1978_s0 + $0xc0] sm:$0xff] }
  0x13   :  { %1107 = vmatprep.mubr.msk.f32.mxu0 %vm96_vm0, %v24_v15  ;;  %1155 = vmatprep.mubr.msk.f32.mxu1 %vm96_vm0, %v56_v16  ;;  %v76_v56 = vld [vmem:[%s1978_s0 + $0x1c0] sm:$0xff]  ;;  %v45_v57 = vld [vmem:[%s1978_s0 + $0xc8] sm:$0xff]  ;;  %v46_v59 = vld [vmem:[%s1978_s0 + $0xd0] sm:$0xff] }
  0x14   :  { %v77_v58 = vld [vmem:[%s1978_s0 + $0x1c8] sm:$0xff]  ;;  %v78_v60 = vld [vmem:[%s1978_s0 + $0x1d0] sm:$0xff]  ;;  %v47_v61 = vld [vmem:[%s1978_s0 + $0xd8] sm:$0xff] }
  0x15   :  { %v79_v62 = vld [vmem:[%s1978_s0 + $0x1d8] sm:$0xff]  ;;  %v48_v63 = vld [vmem:[%s1978_s0 + $0xe0] sm:$0xff]  ;;  %v49_v1 = vld [vmem:[%s1978_s0 + $0xe8] sm:$0xff] }
  0x16   :  { %1108 = vmatmul.mubr.msk.f32.gmra.mrb[4].mxu0 %vm96_vm0, %v25_v17  ;;  %1156 = vmatmul.mubr.msk.f32.gmra.mrb[4].mxu1 %vm96_vm0, %v57_v18  ;;  %v80_v0 = vld [vmem:[%s1978_s0 + $0x1e0] sm:$0xff]  ;;  %v81_v2 = vld [vmem:[%s1978_s0 + $0x1e8] sm:$0xff]  ;;  %v50_v3 = vld [vmem:[%s1978_s0 + $0xf0] sm:$0xff] }
  0x17   :  { %1110 = vmatprep.mubr.msk.f32.mxu0 %vm96_vm0, %v26_v19  ;;  %1158 = vmatprep.mubr.msk.f32.mxu1 %vm96_vm0, %v58_v20  ;;  %v82_v4 = vld [vmem:[%s1978_s0 + $0x1f0] sm:$0xff]  ;;  %v51_v5 = vld [vmem:[%s1978_s0 + $0xf8] sm:$0xff]  ;;  %v813_v9 = vld [vmem:[%s1979_s4] sm:$0x1] }
  0x18   :  { %v83_v6 = vld [vmem:[%s1978_s0 + $0x1f8] sm:$0xff]  ;;  %v814_v10 = vadd.f32 1e-05, %v813_v9  ;;  %v1520_v13 = vld [vmem:[%s1980_s2] ss:$0 sm:$0xff] }
  0x19   :  { %v1527_v20 = vld [vmem:[%s1981_s3] ss:$0 sm:$0xff] }
  0x1a   :  { %1111 = vmatmul.mubr.msk.f32.gmra.mrb[6].mxu0 %vm96_vm0, %v27_v21  ;;  %1159 = vmatmul.mubr.msk.f32.gmra.mrb[6].mxu1 %vm96_vm0, %v59_v22  ;;  %v819_v12 = vrot.slane %v814_v10, %v818_v11 }
  0x1b   :  { %1113 = vmatprep.mubr.msk.f32.mxu0 %vm96_vm0, %v28_v23  ;;  %1161 = vmatprep.mubr.msk.f32.mxu1 %vm96_vm0, %v60_v24 }
  0x1c   :  { %1211 = vrcp.f32 %v819_v12 }
  0x1e   :  { %1114 = vmatmul.mubr.msk.f32.gmra.mrb[8].mxu0 %vm96_vm0, %v29_v25  ;;  %1162 = vmatmul.mubr.msk.f32.gmra.mrb[8].mxu1 %vm96_vm0, %v61_v26 }
  0x1f   :  { %1116 = vmatprep.mubr.msk.f32.mxu0 %vm96_vm0, %v30_v27  ;;  %1164 = vmatprep.mubr.msk.f32.mxu1 %vm96_vm0, %v62_v28 }
  0x22   :  { %1117 = vmatmul.mubr.msk.f32.gmra.mrb[10].mxu0 %vm96_vm0, %v31_v29  ;;  %1165 = vmatmul.mubr.msk.f32.gmra.mrb[10].mxu1 %vm96_vm0, %v63_v30 }
  0x23   :  { %1119 = vmatprep.mubr.msk.f32.mxu0 %vm96_vm0, %v32_v31  ;;  %1167 = vmatprep.mubr.msk.f32.mxu1 %vm96_vm0, %v64_v32 }
  0x26   :  { %1120 = vmatmul.mubr.msk.f32.gmra.mrb[12].mxu0 %vm96_vm0, %v33_v33  ;;  %1168 = vmatmul.mubr.msk.f32.gmra.mrb[12].mxu1 %vm96_vm0, %v65_v34  ;;  %v1531_v25 = vpop.eup %1211 }
  0x27   :  { %1122 = vmatprep.mubr.msk.f32.mxu0 %vm96_vm0, %v34_v35  ;;  %1170 = vmatprep.mubr.msk.f32.mxu1 %vm96_vm0, %v66_v36 }
  0x2a   :  { %1123 = vmatmul.mubr.msk.f32.gmra.mrb[14].mxu0 %vm96_vm0, %v35_v37  ;;  %1171 = vmatmul.mubr.msk.f32.gmra.mrb[14].mxu1 %vm96_vm0, %v67_v38 }
  0x2b   :  { %1125 = vmatprep.mubr.msk.f32.mxu0 %vm96_vm0, %v36_v39  ;;  %1173 = vmatprep.mubr.msk.f32.mxu1 %vm96_vm0, %v68_v40 }
  0x2e   :  { %1126 = vmatmul.mubr.msk.f32.gmra.mrb[16].mxu0 %vm96_vm0, %v37_v41  ;;  %1174 = vmatmul.mubr.msk.f32.gmra.mrb[16].mxu1 %vm96_vm0, %v69_v42 }
  0x2f   :  { %1128 = vmatprep.mubr.msk.f32.mxu0 %vm96_vm0, %v38_v43  ;;  %1176 = vmatprep.mubr.msk.f32.mxu1 %vm96_vm0, %v70_v44 }
  0x32   :  { %1129 = vmatmul.mubr.msk.f32.gmra.mrb[18].mxu0 %vm96_vm0, %v39_v45  ;;  %1177 = vmatmul.mubr.msk.f32.gmra.mrb[18].mxu1 %vm96_vm0, %v71_v46 }
  0x33   :  { %1131 = vmatprep.mubr.msk.f32.mxu0 %vm96_vm0, %v40_v47  ;;  %1179 = vmatprep.mubr.msk.f32.mxu1 %vm96_vm0, %v72_v48 }
  0x36   :  { %1132 = vmatmul.mubr.msk.f32.gmra.mrb[20].mxu0 %vm96_vm0, %v41_v49  ;;  %1180 = vmatmul.mubr.msk.f32.gmra.mrb[20].mxu1 %vm96_vm0, %v73_v50 }
  0x37   :  { %1134 = vmatprep.mubr.msk.f32.mxu0 %vm96_vm0, %v42_v51  ;;  %1182 = vmatprep.mubr.msk.f32.mxu1 %vm96_vm0, %v74_v52 }
  0x3a   :  { %1135 = vmatmul.mubr.msk.f32.gmra.mrb[22].mxu0 %vm96_vm0, %v43_v53  ;;  %1183 = vmatmul.mubr.msk.f32.gmra.mrb[22].mxu1 %vm96_vm0, %v75_v54 }
  0x3b   :  { %1137 = vmatprep.mubr.msk.f32.mxu0 %vm96_vm0, %v44_v55  ;;  %1185 = vmatprep.mubr.msk.f32.mxu1 %vm96_vm0, %v76_v56 }
  0x3e   :  { %1138 = vmatmul.mubr.msk.f32.gmra.mrb[24].mxu0 %vm96_vm0, %v45_v57  ;;  %1186 = vmatmul.mubr.msk.f32.gmra.mrb[24].mxu1 %vm96_vm0, %v77_v58 }
  0x3f   :  { %1140 = vmatprep.mubr.msk.f32.mxu0 %vm96_vm0, %v46_v59  ;;  %1188 = vmatprep.mubr.msk.f32.mxu1 %vm96_vm0, %v78_v60 }
  0x42   :  { %1141 = vmatmul.mubr.msk.f32.gmra.mrb[26].mxu0 %vm96_vm0, %v47_v61  ;;  %1189 = vmatmul.mubr.msk.f32.gmra.mrb[26].mxu1 %vm96_vm0, %v79_v62 }
  0x43   :  { %1143 = vmatprep.mubr.msk.f32.mxu0 %vm96_vm0, %v48_v63  ;;  %1191 = vmatprep.mubr.msk.f32.mxu1 %vm96_vm0, %v80_v0 }
  0x46   :  { %1144 = vmatmul.mubr.msk.f32.gmra.mrb[28].mxu0 %vm96_vm0, %v49_v1  ;;  %1192 = vmatmul.mubr.msk.f32.gmra.mrb[28].mxu1 %vm96_vm0, %v81_v2 }
  0x47   :  { %1146 = vmatprep.mubr.msk.f32.mxu0 %vm96_vm0, %v50_v3  ;;  %1194 = vmatprep.mubr.msk.f32.mxu1 %vm96_vm0, %v82_v4 }
  0x4a   :  { %1147 = vmatmul.mubr.msk.f32.gmra.mrb[30].mxu0 %vm96_vm0, %v51_v5  ;;  %1195 = vmatmul.mubr.msk.f32.gmra.mrb[30].mxu1 %vm96_vm0, %v83_v6 }
  0xe1   :  { %v1103_v14 = vpop.f32.mrb[0].mxu0  ;;  %v1151_v15 = vpop.f32.mrb[0].mxu1 }
  0xe2   :  { %v365_v16 = vadd.f32 %v1103_v14, %v1520_v13  ;;  %v525_v17 = vadd.f32 %v1151_v15, %v1520_v13  ;;  %v359_v18 = vpop.f32.mrb[1].mxu0  ;;  %v519_v19 = vpop.f32.mrb[1].mxu1 }
  0xe3   :  { %v360_v21 = vadd.f32 %v1520_v13, %v359_v18  ;;  %v520_v22 = vadd.f32 %v1520_v13, %v519_v19 }
  0xe4   :  { %v679_v23 = vmax.f32 %v365_v16, 0.0  ;;  %v711_v24 = vmax.f32 %v525_v17, 0.0 }
  0xe5   :  { %v678_v26 = vmax.f32 %v360_v21, 0.0  ;;  %v710_v27 = vmax.f32 %v520_v22, 0.0  ;;  %v1106_v28 = vpop.f32.mrb[2].mxu0  ;;  %v1154_v29 = vpop.f32.mrb[2].mxu1 }
  0xe6   :  { %v750_v30 = vsub.f32 %v679_v23, %v1527_v20  ;;  %v782_v31 = vsub.f32 %v711_v24, %v1527_v20  ;;  %v375_v32 = vadd.f32 %v1106_v28, %v1520_v13  ;;  %v535_v33 = vadd.f32 %v1154_v29, %v1520_v13  ;;  %v369_v34 = vpop.f32.mrb[3].mxu0  ;;  %v529_v35 = vpop.f32.mrb[3].mxu1 }
  0xe7   :  { %v749_v36 = vsub.f32 %v678_v26, %v1527_v20  ;;  %v781_v37 = vsub.f32 %v710_v27, %v1527_v20  ;;  %v370_v38 = vadd.f32 %v1520_v13, %v369_v34  ;;  %v530_v39 = vadd.f32 %v1520_v13, %v529_v35 }
  0xe8   :  { %v823_v40 = vmul.f32 %v1531_v25, %v750_v30  ;;  %v855_v41 = vmul.f32 %v1531_v25, %v782_v31  ;;  %v681_v42 = vmax.f32 %v375_v32, 0.0  ;;  %v713_v43 = vmax.f32 %v535_v33, 0.0 }
  0xe9   :  { %v822_v44 = vmul.f32 %v1531_v25, %v749_v36  ;;  %v854_v45 = vmul.f32 %v1531_v25, %v781_v37  ;;  %v680_v46 = vmax.f32 %v370_v38, 0.0  ;;  %v712_v47 = vmax.f32 %v530_v39, 0.0  ;;  %v1109_v48 = vpop.f32.mrb[4].mxu0  ;;  %v1157_v49 = vpop.f32.mrb[4].mxu1 }
  0xea   :  { %888 = vst.msk [vmem:[%s1982_s5 + $0x8] sm:$0xff] %vm886_vm2, %v823_v40  ;;  %920 = vst.msk [vmem:[%s1982_s5 + $0x108] sm:$0xff] %vm886_vm2, %v855_v41  ;;  %v752_v50 = vsub.f32 %v681_v42, %v1527_v20  ;;  %v784_v51 = vsub.f32 %v713_v43, %v1527_v20  ;;  %v385_v52 = vadd.f32 %v1109_v48, %v1520_v13  ;;  %v379_v54 = vpop.f32.mrb[5].mxu0  ;;  %v539_v55 = vpop.f32.mrb[5].mxu1 }
  0xeb   :  { %v545_v53 = vadd.f32 %v1157_v49, %v1520_v13  ;;  %887 = vst.msk [vmem:[%s1982_s5] sm:$0xff] %vm886_vm2, %v822_v44  ;;  %919 = vst.msk [vmem:[%s1982_s5 + $0x100] sm:$0xff] %vm886_vm2, %v854_v45  ;;  %v751_v56 = vsub.f32 %v680_v46, %v1527_v20  ;;  %v783_v57 = vsub.f32 %v712_v47, %v1527_v20 }
  0xec   :  { %v380_v58 = vadd.f32 %v1520_v13, %v379_v54  ;;  %v540_v59 = vadd.f32 %v1520_v13, %v539_v55  ;;  %v825_v60 = vmul.f32 %v1531_v25, %v752_v50  ;;  %v857_v61 = vmul.f32 %v1531_v25, %v784_v51 }
  0xed   :  { %v683_v62 = vmax.f32 %v385_v52, 0.0  ;;  %v715_v63 = vmax.f32 %v545_v53, 0.0  ;;  %v824_v0 = vmul.f32 %v1531_v25, %v751_v56  ;;  %v856_v1 = vmul.f32 %v1531_v25, %v783_v57  ;;  %v1112_v4 = vpop.f32.mrb[6].mxu0  ;;  %v1160_v5 = vpop.f32.mrb[6].mxu1 }
  0xee   :  { %v682_v2 = vmax.f32 %v380_v58, 0.0  ;;  %v714_v3 = vmax.f32 %v540_v59, 0.0  ;;  %890 = vst.msk [vmem:[%s1982_s5 + $0x18] sm:$0xff] %vm886_vm2, %v825_v60  ;;  %922 = vst.msk [vmem:[%s1982_s5 + $0x118] sm:$0xff] %vm886_vm2, %v857_v61  ;;  %v395_v8 = vadd.f32 %v1112_v4, %v1520_v13  ;;  %v555_v9 = vadd.f32 %v1160_v5, %v1520_v13  ;;  %v389_v10 = vpop.f32.mrb[7].mxu0  ;;  %v549_v11 = vpop.f32.mrb[7].mxu1 }
  0xef   :  { %v754_v6 = vsub.f32 %v683_v62, %v1527_v20  ;;  %v786_v7 = vsub.f32 %v715_v63, %v1527_v20  ;;  %889 = vst.msk [vmem:[%s1982_s5 + $0x10] sm:$0xff] %vm886_vm2, %v824_v0  ;;  %921 = vst.msk [vmem:[%s1982_s5 + $0x110] sm:$0xff] %vm886_vm2, %v856_v1  ;;  %v390_v15 = vadd.f32 %v1520_v13, %v389_v10 }
  0xf0   :  { %v753_v12 = vsub.f32 %v682_v2, %v1527_v20  ;;  %v785_v14 = vsub.f32 %v714_v3, %v1527_v20  ;;  %v550_v16 = vadd.f32 %v1520_v13, %v549_v11  ;;  %v685_v19 = vmax.f32 %v395_v8, 0.0 }
  0xf1   :  { %v827_v17 = vmul.f32 %v1531_v25, %v754_v6  ;;  %v859_v18 = vmul.f32 %v1531_v25, %v786_v7  ;;  %v717_v21 = vmax.f32 %v555_v9, 0.0  ;;  %v684_v24 = vmax.f32 %v390_v15, 0.0  ;;  %v1115_v27 = vpop.f32.mrb[8].mxu0  ;;  %v1163_v28 = vpop.f32.mrb[8].mxu1 }
  0xf2   :  { %v826_v22 = vmul.f32 %v1531_v25, %v753_v12  ;;  %v858_v23 = vmul.f32 %v1531_v25, %v785_v14  ;;  %v716_v26 = vmax.f32 %v550_v16, 0.0  ;;  %v756_v29 = vsub.f32 %v685_v19, %v1527_v20  ;;  %v399_v33 = vpop.f32.mrb[9].mxu0  ;;  %v559_v34 = vpop.f32.mrb[9].mxu1 }
  0xf3   :  { %892 = vst.msk [vmem:[%s1982_s5 + $0x28] sm:$0xff] %vm886_vm2, %v827_v17  ;;  %924 = vst.msk [vmem:[%s1982_s5 + $0x128] sm:$0xff] %vm886_vm2, %v859_v18  ;;  %v788_v30 = vsub.f32 %v717_v21, %v1527_v20  ;;  %v405_v31 = vadd.f32 %v1115_v27, %v1520_v13  ;;  %v565_v32 = vadd.f32 %v1163_v28, %v1520_v13 }
  0xf4   :  { %891 = vst.msk [vmem:[%s1982_s5 + $0x20] sm:$0xff] %vm886_vm2, %v826_v22  ;;  %923 = vst.msk [vmem:[%s1982_s5 + $0x120] sm:$0xff] %vm886_vm2, %v858_v23  ;;  %v755_v35 = vsub.f32 %v684_v24, %v1527_v20  ;;  %v787_v36 = vsub.f32 %v716_v26, %v1527_v20  ;;  %v400_v37 = vadd.f32 %v1520_v13, %v399_v33 }
  0xf5   :  { %v560_v38 = vadd.f32 %v1520_v13, %v559_v34  ;;  %v829_v39 = vmul.f32 %v1531_v25, %v756_v29  ;;  %v861_v40 = vmul.f32 %v1531_v25, %v788_v30  ;;  %v687_v41 = vmax.f32 %v405_v31, 0.0  ;;  %v1118_v47 = vpop.f32.mrb[10].mxu0  ;;  %v1166_v48 = vpop.f32.mrb[10].mxu1 }
  0xf6   :  { %v719_v42 = vmax.f32 %v565_v32, 0.0  ;;  %v828_v43 = vmul.f32 %v1531_v25, %v755_v35  ;;  %v860_v44 = vmul.f32 %v1531_v25, %v787_v36  ;;  %v686_v45 = vmax.f32 %v400_v37, 0.0  ;;  %v409_v53 = vpop.f32.mrb[11].mxu0  ;;  %v569_v54 = vpop.f32.mrb[11].mxu1 }
  0xf7   :  { %v718_v46 = vmax.f32 %v560_v38, 0.0  ;;  %894 = vst.msk [vmem:[%s1982_s5 + $0x38] sm:$0xff] %vm886_vm2, %v829_v39  ;;  %926 = vst.msk [vmem:[%s1982_s5 + $0x138] sm:$0xff] %vm886_vm2, %v861_v40  ;;  %v758_v49 = vsub.f32 %v687_v41, %v1527_v20  ;;  %v415_v51 = vadd.f32 %v1118_v47, %v1520_v13  ;;  %v575_v52 = vadd.f32 %v1166_v48, %v1520_v13 }
  0xf8   :  { %v790_v50 = vsub.f32 %v719_v42, %v1527_v20  ;;  %893 = vst.msk [vmem:[%s1982_s5 + $0x30] sm:$0xff] %vm886_vm2, %v828_v43  ;;  %925 = vst.msk [vmem:[%s1982_s5 + $0x130] sm:$0xff] %vm886_vm2, %v860_v44  ;;  %v757_v55 = vsub.f32 %v686_v45, %v1527_v20  ;;  %v410_v57 = vadd.f32 %v1520_v13, %v409_v53 }
  0xf9   :  { %v789_v56 = vsub.f32 %v718_v46, %v1527_v20  ;;  %v570_v58 = vadd.f32 %v1520_v13, %v569_v54  ;;  %v831_v59 = vmul.f32 %v1531_v25, %v758_v49  ;;  %v689_v61 = vmax.f32 %v415_v51, 0.0  ;;  %v1121_v3 = vpop.f32.mrb[12].mxu0  ;;  %v1169_v4 = vpop.f32.mrb[12].mxu1 }
  0xfa   :  { %v863_v60 = vmul.f32 %v1531_v25, %v790_v50  ;;  %v721_v62 = vmax.f32 %v575_v52, 0.0  ;;  %v830_v63 = vmul.f32 %v1531_v25, %v757_v55  ;;  %v688_v1 = vmax.f32 %v410_v57, 0.0  ;;  %v419_v9 = vpop.f32.mrb[13].mxu0  ;;  %v579_v10 = vpop.f32.mrb[13].mxu1 }
  0xfb   :  { %v862_v0 = vmul.f32 %v1531_v25, %v789_v56  ;;  %v720_v2 = vmax.f32 %v570_v58, 0.0  ;;  %896 = vst.msk [vmem:[%s1982_s5 + $0x48] sm:$0xff] %vm886_vm2, %v831_v59  ;;  %v760_v5 = vsub.f32 %v689_v61, %v1527_v20  ;;  %v425_v7 = vadd.f32 %v1121_v3, %v1520_v13 }
  0xfc   :  { %928 = vst.msk [vmem:[%s1982_s5 + $0x148] sm:$0xff] %vm886_vm2, %v863_v60  ;;  %v792_v6 = vsub.f32 %v721_v62, %v1527_v20  ;;  %v585_v8 = vadd.f32 %v1169_v4, %v1520_v13  ;;  %895 = vst.msk [vmem:[%s1982_s5 + $0x40] sm:$0xff] %vm886_vm2, %v830_v63  ;;  %v759_v11 = vsub.f32 %v688_v1, %v1527_v20 }
  0xfd   :  { %927 = vst.msk [vmem:[%s1982_s5 + $0x140] sm:$0xff] %vm886_vm2, %v862_v0  ;;  %v791_v12 = vsub.f32 %v720_v2, %v1527_v20  ;;  %v420_v14 = vadd.f32 %v1520_v13, %v419_v9  ;;  %v580_v15 = vadd.f32 %v1520_v13, %v579_v10  ;;  %v833_v16 = vmul.f32 %v1531_v25, %v760_v5  ;;  %v1124_v26 = vpop.f32.mrb[14].mxu0  ;;  %v1172_v27 = vpop.f32.mrb[14].mxu1 }
  0xfe   :  { %v865_v17 = vmul.f32 %v1531_v25, %v792_v6  ;;  %v691_v18 = vmax.f32 %v425_v7, 0.0  ;;  %v723_v19 = vmax.f32 %v585_v8, 0.0  ;;  %v832_v21 = vmul.f32 %v1531_v25, %v759_v11  ;;  %v429_v32 = vpop.f32.mrb[15].mxu0  ;;  %v589_v33 = vpop.f32.mrb[15].mxu1 }
  0xff   :  { %v864_v22 = vmul.f32 %v1531_v25, %v791_v12  ;;  %v690_v23 = vmax.f32 %v420_v14, 0.0  ;;  %v722_v24 = vmax.f32 %v580_v15, 0.0  ;;  %898 = vst.msk [vmem:[%s1982_s5 + $0x58] sm:$0xff] %vm886_vm2, %v833_v16  ;;  %v435_v30 = vadd.f32 %v1124_v26, %v1520_v13 }
 0x100   :  { %930 = vst.msk [vmem:[%s1982_s5 + $0x158] sm:$0xff] %vm886_vm2, %v865_v17  ;;  %v762_v28 = vsub.f32 %v691_v18, %v1527_v20  ;;  %v794_v29 = vsub.f32 %v723_v19, %v1527_v20  ;;  %v595_v31 = vadd.f32 %v1172_v27, %v1520_v13  ;;  %897 = vst.msk [vmem:[%s1982_s5 + $0x50] sm:$0xff] %vm886_vm2, %v832_v21 }
 0x101   :  { %929 = vst.msk [vmem:[%s1982_s5 + $0x150] sm:$0xff] %vm886_vm2, %v864_v22  ;;  %v761_v34 = vsub.f32 %v690_v23, %v1527_v20  ;;  %v793_v35 = vsub.f32 %v722_v24, %v1527_v20  ;;  %v430_v36 = vadd.f32 %v1520_v13, %v429_v32  ;;  %v590_v37 = vadd.f32 %v1520_v13, %v589_v33  ;;  %v1127_v46 = vpop.f32.mrb[16].mxu0  ;;  %v1175_v47 = vpop.f32.mrb[16].mxu1 }
 0x102   :  { %v835_v38 = vmul.f32 %v1531_v25, %v762_v28  ;;  %v867_v39 = vmul.f32 %v1531_v25, %v794_v29  ;;  %v693_v40 = vmax.f32 %v435_v30, 0.0  ;;  %v725_v41 = vmax.f32 %v595_v31, 0.0  ;;  %v439_v52 = vpop.f32.mrb[17].mxu0  ;;  %v599_v53 = vpop.f32.mrb[17].mxu1 }
 0x103   :  { %v834_v42 = vmul.f32 %v1531_v25, %v761_v34  ;;  %v866_v43 = vmul.f32 %v1531_v25, %v793_v35  ;;  %v692_v44 = vmax.f32 %v430_v36, 0.0  ;;  %v724_v45 = vmax.f32 %v590_v37, 0.0 }
 0x104   :  { %900 = vst.msk [vmem:[%s1982_s5 + $0x68] sm:$0xff] %vm886_vm2, %v835_v38  ;;  %932 = vst.msk [vmem:[%s1982_s5 + $0x168] sm:$0xff] %vm886_vm2, %v867_v39  ;;  %v764_v48 = vsub.f32 %v693_v40, %v1527_v20  ;;  %v796_v49 = vsub.f32 %v725_v41, %v1527_v20  ;;  %v445_v50 = vadd.f32 %v1127_v46, %v1520_v13 }
 0x105   :  { %v605_v51 = vadd.f32 %v1175_v47, %v1520_v13  ;;  %899 = vst.msk [vmem:[%s1982_s5 + $0x60] sm:$0xff] %vm886_vm2, %v834_v42  ;;  %931 = vst.msk [vmem:[%s1982_s5 + $0x160] sm:$0xff] %vm886_vm2, %v866_v43  ;;  %v763_v54 = vsub.f32 %v692_v44, %v1527_v20  ;;  %v795_v55 = vsub.f32 %v724_v45, %v1527_v20  ;;  %v1130_v2 = vpop.f32.mrb[18].mxu0  ;;  %v1178_v3 = vpop.f32.mrb[18].mxu1 }
 0x106   :  { %v440_v56 = vadd.f32 %v1520_v13, %v439_v52  ;;  %v600_v57 = vadd.f32 %v1520_v13, %v599_v53  ;;  %v837_v58 = vmul.f32 %v1531_v25, %v764_v48  ;;  %v869_v59 = vmul.f32 %v1531_v25, %v796_v49  ;;  %v449_v8 = vpop.f32.mrb[19].mxu0  ;;  %v609_v9 = vpop.f32.mrb[19].mxu1 }
 0x107   :  { %v695_v60 = vmax.f32 %v445_v50, 0.0  ;;  %v727_v61 = vmax.f32 %v605_v51, 0.0  ;;  %v836_v62 = vmul.f32 %v1531_v25, %v763_v54  ;;  %v868_v63 = vmul.f32 %v1531_v25, %v795_v55 }
 0x108   :  { %v694_v0 = vmax.f32 %v440_v56, 0.0  ;;  %v726_v1 = vmax.f32 %v600_v57, 0.0  ;;  %902 = vst.msk [vmem:[%s1982_s5 + $0x78] sm:$0xff] %vm886_vm2, %v837_v58  ;;  %934 = vst.msk [vmem:[%s1982_s5 + $0x178] sm:$0xff] %vm886_vm2, %v869_v59  ;;  %v455_v6 = vadd.f32 %v1130_v2, %v1520_v13  ;;  %v615_v7 = vadd.f32 %v1178_v3, %v1520_v13 }
 0x109   :  { %v766_v4 = vsub.f32 %v695_v60, %v1527_v20  ;;  %v798_v5 = vsub.f32 %v727_v61, %v1527_v20  ;;  %901 = vst.msk [vmem:[%s1982_s5 + $0x70] sm:$0xff] %vm886_vm2, %v836_v62  ;;  %933 = vst.msk [vmem:[%s1982_s5 + $0x170] sm:$0xff] %vm886_vm2, %v868_v63  ;;  %v450_v12 = vadd.f32 %v1520_v13, %v449_v8  ;;  %v1133_v24 = vpop.f32.mrb[20].mxu0  ;;  %v1181_v26 = vpop.f32.mrb[20].mxu1 }
 0x10a   :  { %v765_v10 = vsub.f32 %v694_v0, %v1527_v20  ;;  %v797_v11 = vsub.f32 %v726_v1, %v1527_v20  ;;  %v610_v14 = vadd.f32 %v1520_v13, %v609_v9  ;;  %v697_v17 = vmax.f32 %v455_v6, 0.0  ;;  %v459_v31 = vpop.f32.mrb[21].mxu0  ;;  %v619_v32 = vpop.f32.mrb[21].mxu1 }
 0x10b   :  { %v839_v15 = vmul.f32 %v1531_v25, %v766_v4  ;;  %v871_v16 = vmul.f32 %v1531_v25, %v798_v5  ;;  %v729_v18 = vmax.f32 %v615_v7, 0.0  ;;  %v696_v22 = vmax.f32 %v450_v12, 0.0 }
 0x10c   :  { %v838_v19 = vmul.f32 %v1531_v25, %v765_v10  ;;  %v870_v21 = vmul.f32 %v1531_v25, %v797_v11  ;;  %v728_v23 = vmax.f32 %v610_v14, 0.0  ;;  %v768_v27 = vsub.f32 %v697_v17, %v1527_v20 }
 0x10d   :  { %904 = vst.msk [vmem:[%s1982_s5 + $0x88] sm:$0xff] %vm886_vm2, %v839_v15  ;;  %936 = vst.msk [vmem:[%s1982_s5 + $0x188] sm:$0xff] %vm886_vm2, %v871_v16  ;;  %v800_v28 = vsub.f32 %v729_v18, %v1527_v20  ;;  %v465_v29 = vadd.f32 %v1133_v24, %v1520_v13  ;;  %v625_v30 = vadd.f32 %v1181_v26, %v1520_v13  ;;  %v1136_v45 = vpop.f32.mrb[22].mxu0  ;;  %v1184_v46 = vpop.f32.mrb[22].mxu1 }
 0x10e   :  { %903 = vst.msk [vmem:[%s1982_s5 + $0x80] sm:$0xff] %vm886_vm2, %v838_v19  ;;  %935 = vst.msk [vmem:[%s1982_s5 + $0x180] sm:$0xff] %vm886_vm2, %v870_v21  ;;  %v767_v33 = vsub.f32 %v696_v22, %v1527_v20  ;;  %v799_v34 = vsub.f32 %v728_v23, %v1527_v20  ;;  %v460_v35 = vadd.f32 %v1520_v13, %v459_v31  ;;  %v469_v51 = vpop.f32.mrb[23].mxu0  ;;  %v629_v52 = vpop.f32.mrb[23].mxu1 }
 0x10f   :  { %v620_v36 = vadd.f32 %v1520_v13, %v619_v32  ;;  %v841_v37 = vmul.f32 %v1531_v25, %v768_v27  ;;  %v873_v38 = vmul.f32 %v1531_v25, %v800_v28  ;;  %v699_v39 = vmax.f32 %v465_v29, 0.0 }
 0x110   :  { %v731_v40 = vmax.f32 %v625_v30, 0.0  ;;  %v840_v41 = vmul.f32 %v1531_v25, %v767_v33  ;;  %v872_v42 = vmul.f32 %v1531_v25, %v799_v34  ;;  %v698_v43 = vmax.f32 %v460_v35, 0.0 }
 0x111   :  { %v730_v44 = vmax.f32 %v620_v36, 0.0  ;;  %906 = vst.msk [vmem:[%s1982_s5 + $0x98] sm:$0xff] %vm886_vm2, %v841_v37  ;;  %938 = vst.msk [vmem:[%s1982_s5 + $0x198] sm:$0xff] %vm886_vm2, %v873_v38  ;;  %v770_v47 = vsub.f32 %v699_v39, %v1527_v20  ;;  %v475_v49 = vadd.f32 %v1136_v45, %v1520_v13  ;;  %v635_v50 = vadd.f32 %v1184_v46, %v1520_v13  ;;  %v1139_v1 = vpop.f32.mrb[24].mxu0  ;;  %v1187_v2 = vpop.f32.mrb[24].mxu1 }
 0x112   :  { %v802_v48 = vsub.f32 %v731_v40, %v1527_v20  ;;  %905 = vst.msk [vmem:[%s1982_s5 + $0x90] sm:$0xff] %vm886_vm2, %v840_v41  ;;  %937 = vst.msk [vmem:[%s1982_s5 + $0x190] sm:$0xff] %vm886_vm2, %v872_v42  ;;  %v769_v53 = vsub.f32 %v698_v43, %v1527_v20  ;;  %v470_v55 = vadd.f32 %v1520_v13, %v469_v51  ;;  %v479_v7 = vpop.f32.mrb[25].mxu0  ;;  %v639_v8 = vpop.f32.mrb[25].mxu1 }
 0x113   :  { %v801_v54 = vsub.f32 %v730_v44, %v1527_v20  ;;  %v630_v56 = vadd.f32 %v1520_v13, %v629_v52  ;;  %v843_v57 = vmul.f32 %v1531_v25, %v770_v47  ;;  %v701_v59 = vmax.f32 %v475_v49, 0.0 }
 0x114   :  { %v875_v58 = vmul.f32 %v1531_v25, %v802_v48  ;;  %v733_v60 = vmax.f32 %v635_v50, 0.0  ;;  %v842_v61 = vmul.f32 %v1531_v25, %v769_v53  ;;  %v700_v63 = vmax.f32 %v470_v55, 0.0 }
 0x115   :  { %v874_v62 = vmul.f32 %v1531_v25, %v801_v54  ;;  %v732_v0 = vmax.f32 %v630_v56, 0.0  ;;  %908 = vst.msk [vmem:[%s1982_s5 + $0xa8] sm:$0xff] %vm886_vm2, %v843_v57  ;;  %v772_v3 = vsub.f32 %v701_v59, %v1527_v20  ;;  %v485_v5 = vadd.f32 %v1139_v1, %v1520_v13  ;;  %v1142_v23 = vpop.f32.mrb[26].mxu0  ;;  %v1190_v24 = vpop.f32.mrb[26].mxu1 }
 0x116   :  { %940 = vst.msk [vmem:[%s1982_s5 + $0x1a8] sm:$0xff] %vm886_vm2, %v875_v58  ;;  %v804_v4 = vsub.f32 %v733_v60, %v1527_v20  ;;  %v645_v6 = vadd.f32 %v1187_v2, %v1520_v13  ;;  %907 = vst.msk [vmem:[%s1982_s5 + $0xa0] sm:$0xff] %vm886_vm2, %v842_v61  ;;  %v771_v9 = vsub.f32 %v700_v63, %v1527_v20  ;;  %v489_v30 = vpop.f32.mrb[27].mxu0  ;;  %v649_v31 = vpop.f32.mrb[27].mxu1 }
 0x117   :  { %939 = vst.msk [vmem:[%s1982_s5 + $0x1a0] sm:$0xff] %vm886_vm2, %v874_v62  ;;  %v803_v10 = vsub.f32 %v732_v0, %v1527_v20  ;;  %v480_v11 = vadd.f32 %v1520_v13, %v479_v7  ;;  %v640_v12 = vadd.f32 %v1520_v13, %v639_v8  ;;  %v845_v14 = vmul.f32 %v1531_v25, %v772_v3 }
 0x118   :  { %v877_v15 = vmul.f32 %v1531_v25, %v804_v4  ;;  %v703_v16 = vmax.f32 %v485_v5, 0.0  ;;  %v735_v17 = vmax.f32 %v645_v6, 0.0  ;;  %v844_v18 = vmul.f32 %v1531_v25, %v771_v9 }
 0x119   :  { %v876_v19 = vmul.f32 %v1531_v25, %v803_v10  ;;  %v702_v21 = vmax.f32 %v480_v11, 0.0  ;;  %v734_v22 = vmax.f32 %v640_v12, 0.0  ;;  %910 = vst.msk [vmem:[%s1982_s5 + $0xb8] sm:$0xff] %vm886_vm2, %v845_v14  ;;  %v495_v28 = vadd.f32 %v1142_v23, %v1520_v13  ;;  %v1145_v44 = vpop.f32.mrb[28].mxu0  ;;  %v1193_v45 = vpop.f32.mrb[28].mxu1 }
 0x11a   :  { %942 = vst.msk [vmem:[%s1982_s5 + $0x1b8] sm:$0xff] %vm886_vm2, %v877_v15  ;;  %v774_v26 = vsub.f32 %v703_v16, %v1527_v20  ;;  %v806_v27 = vsub.f32 %v735_v17, %v1527_v20  ;;  %v655_v29 = vadd.f32 %v1190_v24, %v1520_v13  ;;  %909 = vst.msk [vmem:[%s1982_s5 + $0xb0] sm:$0xff] %vm886_vm2, %v844_v18  ;;  %v499_v50 = vpop.f32.mrb[29].mxu0  ;;  %v659_v51 = vpop.f32.mrb[29].mxu1 }
 0x11b   :  { %941 = vst.msk [vmem:[%s1982_s5 + $0x1b0] sm:$0xff] %vm886_vm2, %v876_v19  ;;  %v773_v32 = vsub.f32 %v702_v21, %v1527_v20  ;;  %v805_v33 = vsub.f32 %v734_v22, %v1527_v20  ;;  %v490_v34 = vadd.f32 %v1520_v13, %v489_v30  ;;  %v650_v35 = vadd.f32 %v1520_v13, %v649_v31 }
 0x11c   :  { %v847_v36 = vmul.f32 %v1531_v25, %v774_v26  ;;  %v879_v37 = vmul.f32 %v1531_v25, %v806_v27  ;;  %v705_v38 = vmax.f32 %v495_v28, 0.0  ;;  %v737_v39 = vmax.f32 %v655_v29, 0.0 }
 0x11d   :  { %v846_v40 = vmul.f32 %v1531_v25, %v773_v32  ;;  %v878_v41 = vmul.f32 %v1531_v25, %v805_v33  ;;  %v704_v42 = vmax.f32 %v490_v34, 0.0  ;;  %v736_v43 = vmax.f32 %v650_v35, 0.0  ;;  %v1148_v0 = vpop.f32.mrb[30].mxu0  ;;  %v1196_v1 = vpop.f32.mrb[30].mxu1 }
 0x11e   :  { %912 = vst.msk [vmem:[%s1982_s5 + $0xc8] sm:$0xff] %vm886_vm2, %v847_v36  ;;  %944 = vst.msk [vmem:[%s1982_s5 + $0x1c8] sm:$0xff] %vm886_vm2, %v879_v37  ;;  %v776_v46 = vsub.f32 %v705_v38, %v1527_v20  ;;  %v808_v47 = vsub.f32 %v737_v39, %v1527_v20  ;;  %v505_v48 = vadd.f32 %v1145_v44, %v1520_v13  ;;  %v509_v6 = vpop.f32.mrb[31].mxu0  ;;  %v669_v7 = vpop.f32.mrb[31].mxu1 }
 0x11f   :  { %v665_v49 = vadd.f32 %v1193_v45, %v1520_v13  ;;  %911 = vst.msk [vmem:[%s1982_s5 + $0xc0] sm:$0xff] %vm886_vm2, %v846_v40  ;;  %943 = vst.msk [vmem:[%s1982_s5 + $0x1c0] sm:$0xff] %vm886_vm2, %v878_v41  ;;  %v775_v52 = vsub.f32 %v704_v42, %v1527_v20  ;;  %v807_v53 = vsub.f32 %v736_v43, %v1527_v20 }
 0x120   :  { %v500_v54 = vadd.f32 %v1520_v13, %v499_v50  ;;  %v660_v55 = vadd.f32 %v1520_v13, %v659_v51  ;;  %v849_v56 = vmul.f32 %v1531_v25, %v776_v46  ;;  %v881_v57 = vmul.f32 %v1531_v25, %v808_v47 }
 0x121   :  { %v707_v58 = vmax.f32 %v505_v48, 0.0  ;;  %v739_v59 = vmax.f32 %v665_v49, 0.0  ;;  %v848_v60 = vmul.f32 %v1531_v25, %v775_v52  ;;  %v880_v61 = vmul.f32 %v1531_v25, %v807_v53 }
 0x122   :  { %v706_v62 = vmax.f32 %v500_v54, 0.0  ;;  %v738_v63 = vmax.f32 %v660_v55, 0.0  ;;  %914 = vst.msk [vmem:[%s1982_s5 + $0xd8] sm:$0xff] %vm886_vm2, %v849_v56  ;;  %946 = vst.msk [vmem:[%s1982_s5 + $0x1d8] sm:$0xff] %vm886_vm2, %v881_v57  ;;  %v515_v4 = vadd.f32 %v1148_v0, %v1520_v13  ;;  %v675_v5 = vadd.f32 %v1196_v1, %v1520_v13 }
 0x123   :  { %v778_v2 = vsub.f32 %v707_v58, %v1527_v20  ;;  %v810_v3 = vsub.f32 %v739_v59, %v1527_v20  ;;  %913 = vst.msk [vmem:[%s1982_s5 + $0xd0] sm:$0xff] %vm886_vm2, %v848_v60  ;;  %945 = vst.msk [vmem:[%s1982_s5 + $0x1d0] sm:$0xff] %vm886_vm2, %v880_v61  ;;  %v510_v10 = vadd.f32 %v1520_v13, %v509_v6 }
 0x124   :  { %v777_v8 = vsub.f32 %v706_v62, %v1527_v20  ;;  %v809_v9 = vsub.f32 %v738_v63, %v1527_v20  ;;  %v670_v11 = vadd.f32 %v1520_v13, %v669_v7  ;;  %v709_v15 = vmax.f32 %v515_v4, 0.0 }
 0x125   :  { %v851_v12 = vmul.f32 %v1531_v25, %v778_v2  ;;  %v883_v14 = vmul.f32 %v1531_v25, %v810_v3  ;;  %v741_v16 = vmax.f32 %v675_v5, 0.0  ;;  %v708_v19 = vmax.f32 %v510_v10, 0.0 }
 0x126   :  { %v850_v17 = vmul.f32 %v1531_v25, %v777_v8  ;;  %v882_v18 = vmul.f32 %v1531_v25, %v809_v9  ;;  %v740_v21 = vmax.f32 %v670_v11, 0.0  ;;  %v780_v13 = vsub.f32 %v709_v15, %v1527_v20 }
 0x127   :  { %916 = vst.msk [vmem:[%s1982_s5 + $0xe8] sm:$0xff] %vm886_vm2, %v851_v12  ;;  %948 = vst.msk [vmem:[%s1982_s5 + $0x1e8] sm:$0xff] %vm886_vm2, %v883_v14  ;;  %v812_v22 = vsub.f32 %v741_v16, %v1527_v20  ;;  %v779_v23 = vsub.f32 %v708_v19, %v1527_v20 }
 0x128   :  { %915 = vst.msk [vmem:[%s1982_s5 + $0xe0] sm:$0xff] %vm886_vm2, %v850_v17  ;;  %947 = vst.msk [vmem:[%s1982_s5 + $0x1e0] sm:$0xff] %vm886_vm2, %v882_v18  ;;  %v811_v24 = vsub.f32 %v740_v21, %v1527_v20  ;;  %v853_v26 = vmul.f32 %v1531_v25, %v780_v13 }
 0x129   :  { %v885_v27 = vmul.f32 %v1531_v25, %v812_v22  ;;  %v852_v28 = vmul.f32 %v1531_v25, %v779_v23 }
 0x12a   :  { %v884_v29 = vmul.f32 %v1531_v25, %v811_v24  ;;  %918 = vst.msk [vmem:[%s1982_s5 + $0xf8] sm:$0xff] %vm886_vm2, %v853_v26 }
 0x12b   :  { %950 = vst.msk [vmem:[%s1982_s5 + $0x1f8] sm:$0xff] %vm886_vm2, %v885_v27  ;;  %917 = vst.msk [vmem:[%s1982_s5 + $0xf0] sm:$0xff] %vm886_vm2, %v852_v28 }
 0x12c   :  { %949 = vst.msk [vmem:[%s1982_s5 + $0x1f0] sm:$0xff] %vm886_vm2, %v884_v29 }

</bundles_post_ra>
